<compile_context>
chip_gen: v7x
topology: tpu7x:2x2x1
jax: 0.10.0
libtpu: 0.0.40
codegen_flags: <defaults>
</compile_context>

<pallas_src>
import functools

import jax
import jax.numpy as jnp
from jax.experimental import pallas as pl
from jax.experimental.pallas import tpu as pltpu

_EPS = 1e-6  # torch F.pairwise_distance default eps (added to the difference)


def _round_up(x, m):
    return -(-x // m) * m


def _vmem_config():
    """(scoped vmem_limit_bytes, per-tile working-set budget) per TPU generation."""
    limit, budget = 32 * 1024 * 1024, 16 * 1024 * 1024  # safe everywhere (v7x: 64 MiB phys)
    try:
        cap = int(getattr(pltpu.get_tpu_info(), "vmem_capacity_bytes", 0) or 0)
        if cap >= 100 * 1024 * 1024:                      # v5e / v6e: 128 MiB physical VMEM
            limit, budget = 64 * 1024 * 1024, 40 * 1024 * 1024
    except Exception:
        pass
    return limit, budget


def _choose_tile(bq, dp, itemsize, budget):
    """Largest multiple-of-8 (packed-)row tile whose working set fits the budget.

    Counts the 3 double-buffered native-dtype inputs plus ~7 f32 per-row temporaries
    (upcasts, diffs, squares) materialized inside the kernel body.
    """
    per_row = 3 * 2 * dp * itemsize + 7 * dp * 4
    tile = max(8, (budget // per_row) // 8 * 8)
    return min(tile, _round_up(bq, 8))


def _triplet_loss_kernel(a_ref, p_ref, n_ref, o_ref, *,
                         margin, batch, k, d, tile, need_mask):
    i = pl.program_id(0)

    # Upcast in-kernel so callers can pass bf16 without doubling HBM traffic.
    a = a_ref[...].astype(jnp.float32)
    p = p_ref[...].astype(jnp.float32)
    n = n_ref[...].astype(jnp.float32)

    # F.pairwise_distance adds eps to the difference; hoist it onto the shared operand.
    ae = a + _EPS
    dpos = ae - p
    dneg = ae - n
    dpos2 = dpos * dpos
    dneg2 = dneg * dneg

    # Per packed segment s (original row = packed_row * k + s): reduce its D lanes.
    losses = []
    for s in range(k):
        sl = slice(s * d, (s + 1) * d)
        pos = jnp.sqrt(jnp.sum(dpos2[:, sl], axis=-1, keepdims=True))   # (tile, 1)
        neg = jnp.sqrt(jnp.sum(dneg2[:, sl], axis=-1, keepdims=True))   # (tile, 1)
        losses.append(jnp.maximum(pos - neg + margin, 0.0))
    # TODO(synk): the per-segment reduction could instead be one (tile, k*d) x (k*d, k)
    # block-diagonal-ones matmul on the otherwise-idle MXU, if full-f32 matmul
    # precision is guaranteed for this shape; kept on VPU/XLU here for exactness.

    def tile_sum(masked):
        total = jnp.zeros((1, 1), jnp.float32)
        if masked:
            # Mask padded original rows (B rounded up to a multiple of k) and the
            # undefined rows of a ragged last grid tile.  Must stay AFTER the max.
            row = i * tile + jax.lax.broadcasted_iota(jnp.int32, (tile, 1), 0)
            for s, loss_s in enumerate(losses):
                valid = row * k + s < batch
                total = total + jnp.sum(jnp.where(valid, loss_s, 0.0), keepdims=True)
        else:
            for loss_s in losses:
                total = total + jnp.sum(loss_s, keepdims=True)
        return total.reshape(1, 1, 1)

    if need_mask:
        last = pl.num_programs(0) - 1

        @pl.when(i != last)
        def _():
            o_ref[...] = tile_sum(False)

        @pl.when(i == last)
        def _():
            o_ref[...] = tile_sum(True)
    else:
        o_ref[...] = tile_sum(False)


def triplet_loss(anchor, positive, negative, margin=1.0, *, tile=None):
    """Pallas TPU implementation of TripletLoss(margin).forward(anchor, positive, negative)."""
    assert anchor.shape == positive.shape == negative.shape
    assert anchor.ndim == 2, "expected (B, D) inputs"
    B, D = anchor.shape
    itemsize = jnp.dtype(anchor.dtype).itemsize

    # Lane-dense packing factor: k original rows per 128-lane row (zero-copy reshape).
    k = 128 // D if (0 < D < 128 and 128 % D == 0) else 1

    a, p, n = anchor, positive, negative
    if k > 1:
        b_pad = _round_up(B, k)
        if b_pad != B:
            pad = ((0, b_pad - B), (0, 0))
            a = jnp.pad(a, pad)
            p = jnp.pad(p, pad)
            n = jnp.pad(n, pad)
        a = a.reshape(b_pad // k, k * D)
        p = p.reshape(b_pad // k, k * D)
        n = n.reshape(b_pad // k, k * D)

    bq, dp = a.shape                      # packed rows, packed feature width

    vmem_limit, budget = _vmem_config()
    if tile is None:
        tile = _choose_tile(bq, dp, itemsize, budget)
    else:
        tile = max(8, _round_up(int(tile), 8))
    num_tiles = pl.cdiv(bq, tile)
    need_mask = (num_tiles * tile * k) != B   # any padded / undefined rows at the end?

    kernel = functools.partial(
        _triplet_loss_kernel, margin=float(margin), batch=B,
        k=k, d=D, tile=tile, need_mask=need_mask)

    in_spec = pl.BlockSpec((tile, dp), lambda i: (i, 0))

    partials = pl.pallas_call(
        kernel,
        out_shape=jax.ShapeDtypeStruct((num_tiles, 1, 1), jnp.float32),
        grid_spec=pltpu.PrefetchScalarGridSpec(
            num_scalar_prefetch=0,
            grid=(num_tiles,),
            in_specs=[in_spec, in_spec, in_spec],
            out_specs=pl.BlockSpec((1, 1, 1), lambda i: (i, 0, 0)),
        ),
        compiler_params=pltpu.CompilerParams(
            dimension_semantics=("parallel",),     # per-tile partials -> no cross-step dep
            vmem_limit_bytes=vmem_limit,
        ),
        cost_estimate=pl.CostEstimate(
            flops=7 * B * D,
            transcendentals=2 * B,
            bytes_accessed=3 * B * D * itemsize + num_tiles * 4,
        ),
    )(a, p, n)

    # Final mean over the original batch (padded rows were masked to zero).
    return jnp.sum(partials) / B


def _ref_loss(a, p, n, margin=1.0, eps=_EPS):
    """Plain-JAX reference (same math as torch F.pairwise_distance)."""
    a = a.astype(jnp.float32)
    p = p.astype(jnp.float32)
    n = n.astype(jnp.float32)
    pos = jnp.sqrt(jnp.sum((a - p + eps) ** 2, axis=-1))
    neg = jnp.sqrt(jnp.sum((a - n + eps) ** 2, axis=-1))
    return jnp.mean(jnp.maximum(pos - neg + margin, 0.0))


if __name__ == "__main__":
    key = jax.random.PRNGKey(0)
    ks = jax.random.split(key, 12)

    def _check(a, p, n, margin, **kw):
        got = triplet_loss(a, p, n, margin=margin, **kw)
        jax.block_until_ready(got)
        want = _ref_loss(a, p, n, margin=margin)
        assert jnp.allclose(got, want, rtol=1e-5, atol=1e-5), (got, want)

    # 1) Lane-packed (D=32 -> 4 rows per 128 lanes), single tile.
    B, D = 8, 32
    a1 = jax.random.normal(ks[0], (B, D), jnp.float32)
    p1 = jax.random.normal(ks[1], (B, D), jnp.float32)
    n1 = jax.random.normal(ks[2], (B, D), jnp.float32)
    _check(a1, p1, n1, 1.0)

    # 2) Packed + ragged batch (zero-pad to a multiple of k, mask in last tile).
    a2 = jax.random.normal(ks[3], (21, D), jnp.float32)
    p2 = jax.random.normal(ks[4], (21, D), jnp.float32)
    n2 = jax.random.normal(ks[5], (21, D), jnp.float32)
    _check(a2, p2, n2, 0.5)

    # 3) Packed, forced multi-tile grid: per-tile partial sums on the "parallel" axis.
    a3 = jax.random.normal(ks[6], (40, D), jnp.float32)
    p3 = jax.random.normal(ks[7], (40, D), jnp.float32)
    n3 = jax.random.normal(ks[8], (40, D), jnp.float32)
    _check(a3, p3, n3, 1.0, tile=8)

    # 4) Non-packable feature dim (k = 1 path), multi-tile, batch tiles evenly (no mask).
    a4 = jax.random.normal(ks[9], (24, 200), jnp.float32)
    p4 = jax.random.normal(ks[10], (24, 200), jnp.float32)
    n4 = jax.random.normal(ks[11], (24, 200), jnp.float32)
    _check(a4, p4, n4, 1.0, tile=8)

    # 5) bf16 inputs (upcast to f32 inside the kernel).
    _check(a1.astype(jnp.bfloat16), p1.astype(jnp.bfloat16),
           n1.astype(jnp.bfloat16), 1.0)

    print("KERNEL_OK")
</pallas_src>

<mosaic_0001>
module attributes {stable_mosaic.version = 11 : i64} {
  func.func @_triplet_loss_kernel(%arg0: i32, %arg1: memref<8x128xf32, #tpu.memory_space<vmem>>, %arg2: memref<8x128xf32, #tpu.memory_space<vmem>>, %arg3: memref<8x128xf32, #tpu.memory_space<vmem>>, %arg4: memref<1x1x1xf32, #tpu.memory_space<vmem>>) attributes {dimension_semantics = [#tpu.dimension_semantics<parallel>], iteration_bounds = array<i64: 1>, scalar_prefetch = 0 : i64, scratch_operands = 0 : i64, tpu.core_type = #tpu.core_type<tc>, window_params = [{transform_indices = @transform_0, window_bounds = array<i64: 8, 128>}, {transform_indices = @transform_1, window_bounds = array<i64: 8, 128>}, {transform_indices = @transform_2, window_bounds = array<i64: 8, 128>}, {transform_indices = @transform_3, window_bounds = array<i64: 1, 1, 1>}]} {
    %c0 = arith.constant 0 : index
    %c0_0 = arith.constant 0 : index
    %0 = vector.load %arg1[%c0, %c0_0] : memref<8x128xf32, #tpu.memory_space<vmem>>, vector<8x128xf32>
    %c0_1 = arith.constant 0 : index
    %c0_2 = arith.constant 0 : index
    %1 = vector.load %arg2[%c0_1, %c0_2] : memref<8x128xf32, #tpu.memory_space<vmem>>, vector<8x128xf32>
    %c0_3 = arith.constant 0 : index
    %c0_4 = arith.constant 0 : index
    %2 = vector.load %arg3[%c0_3, %c0_4] : memref<8x128xf32, #tpu.memory_space<vmem>>, vector<8x128xf32>
    %cst = arith.constant 9.99999997E-7 : f32
    %3 = vector.broadcast %cst : f32 to vector<8x128xf32>
    %4 = arith.addf %0, %3 : vector<8x128xf32>
    %5 = arith.subf %4, %1 : vector<8x128xf32>
    %6 = arith.subf %4, %2 : vector<8x128xf32>
    %7 = arith.mulf %5, %5 : vector<8x128xf32>
    %8 = arith.mulf %6, %6 : vector<8x128xf32>
    %9 = vector.extract_strided_slice %7 {offsets = [0, 0], sizes = [8, 32], strides = [1, 1]} : vector<8x128xf32> to vector<8x32xf32>
    %cst_5 = arith.constant dense<0.000000e+00> : vector<8xf32>
    %10 = vector.multi_reduction <add>, %9, %cst_5 [1] : vector<8x32xf32> to vector<8xf32>
    %11 = vector.shape_cast %10 : vector<8xf32> to vector<8x1xf32>
    %12 = math.sqrt %11 : vector<8x1xf32>
    %13 = vector.extract_strided_slice %8 {offsets = [0, 0], sizes = [8, 32], strides = [1, 1]} : vector<8x128xf32> to vector<8x32xf32>
    %cst_6 = arith.constant dense<0.000000e+00> : vector<8xf32>
    %14 = vector.multi_reduction <add>, %13, %cst_6 [1] : vector<8x32xf32> to vector<8xf32>
    %15 = vector.shape_cast %14 : vector<8xf32> to vector<8x1xf32>
    %16 = math.sqrt %15 : vector<8x1xf32>
    %17 = arith.subf %12, %16 : vector<8x1xf32>
    %cst_7 = arith.constant 1.000000e+00 : f32
    %18 = vector.broadcast %cst_7 : f32 to vector<8x1xf32>
    %19 = arith.addf %17, %18 : vector<8x1xf32>
    %cst_8 = arith.constant 0.000000e+00 : f32
    %20 = vector.broadcast %cst_8 : f32 to vector<8x1xf32>
    %21 = arith.maximumf %19, %20 : vector<8x1xf32>
    %22 = vector.extract_strided_slice %7 {offsets = [0, 32], sizes = [8, 32], strides = [1, 1]} : vector<8x128xf32> to vector<8x32xf32>
    %cst_9 = arith.constant dense<0.000000e+00> : vector<8xf32>
    %23 = vector.multi_reduction <add>, %22, %cst_9 [1] : vector<8x32xf32> to vector<8xf32>
    %24 = vector.shape_cast %23 : vector<8xf32> to vector<8x1xf32>
    %25 = math.sqrt %24 : vector<8x1xf32>
    %26 = vector.extract_strided_slice %8 {offsets = [0, 32], sizes = [8, 32], strides = [1, 1]} : vector<8x128xf32> to vector<8x32xf32>
    %cst_10 = arith.constant dense<0.000000e+00> : vector<8xf32>
    %27 = vector.multi_reduction <add>, %26, %cst_10 [1] : vector<8x32xf32> to vector<8xf32>
    %28 = vector.shape_cast %27 : vector<8xf32> to vector<8x1xf32>
    %29 = math.sqrt %28 : vector<8x1xf32>
    %30 = arith.subf %25, %29 : vector<8x1xf32>
    %cst_11 = arith.constant 1.000000e+00 : f32
    %31 = vector.broadcast %cst_11 : f32 to vector<8x1xf32>
    %32 = arith.addf %30, %31 : vector<8x1xf32>
    %cst_12 = arith.constant 0.000000e+00 : f32
    %33 = vector.broadcast %cst_12 : f32 to vector<8x1xf32>
    %34 = arith.maximumf %32, %33 : vector<8x1xf32>
    %35 = vector.extract_strided_slice %7 {offsets = [0, 64], sizes = [8, 32], strides = [1, 1]} : vector<8x128xf32> to vector<8x32xf32>
    %cst_13 = arith.constant dense<0.000000e+00> : vector<8xf32>
    %36 = vector.multi_reduction <add>, %35, %cst_13 [1] : vector<8x32xf32> to vector<8xf32>
    %37 = vector.shape_cast %36 : vector<8xf32> to vector<8x1xf32>
    %38 = math.sqrt %37 : vector<8x1xf32>
    %39 = vector.extract_strided_slice %8 {offsets = [0, 64], sizes = [8, 32], strides = [1, 1]} : vector<8x128xf32> to vector<8x32xf32>
    %cst_14 = arith.constant dense<0.000000e+00> : vector<8xf32>
    %40 = vector.multi_reduction <add>, %39, %cst_14 [1] : vector<8x32xf32> to vector<8xf32>
    %41 = vector.shape_cast %40 : vector<8xf32> to vector<8x1xf32>
    %42 = math.sqrt %41 : vector<8x1xf32>
    %43 = arith.subf %38, %42 : vector<8x1xf32>
    %cst_15 = arith.constant 1.000000e+00 : f32
    %44 = vector.broadcast %cst_15 : f32 to vector<8x1xf32>
    %45 = arith.addf %43, %44 : vector<8x1xf32>
    %cst_16 = arith.constant 0.000000e+00 : f32
    %46 = vector.broadcast %cst_16 : f32 to vector<8x1xf32>
    %47 = arith.maximumf %45, %46 : vector<8x1xf32>
    %48 = vector.extract_strided_slice %7 {offsets = [0, 96], sizes = [8, 32], strides = [1, 1]} : vector<8x128xf32> to vector<8x32xf32>
    %cst_17 = arith.constant dense<0.000000e+00> : vector<8xf32>
    %49 = vector.multi_reduction <add>, %48, %cst_17 [1] : vector<8x32xf32> to vector<8xf32>
    %50 = vector.shape_cast %49 : vector<8xf32> to vector<8x1xf32>
    %51 = math.sqrt %50 : vector<8x1xf32>
    %52 = vector.extract_strided_slice %8 {offsets = [0, 96], sizes = [8, 32], strides = [1, 1]} : vector<8x128xf32> to vector<8x32xf32>
    %cst_18 = arith.constant dense<0.000000e+00> : vector<8xf32>
    %53 = vector.multi_reduction <add>, %52, %cst_18 [1] : vector<8x32xf32> to vector<8xf32>
    %54 = vector.shape_cast %53 : vector<8xf32> to vector<8x1xf32>
    %55 = math.sqrt %54 : vector<8x1xf32>
    %56 = arith.subf %51, %55 : vector<8x1xf32>
    %cst_19 = arith.constant 1.000000e+00 : f32
    %57 = vector.broadcast %cst_19 : f32 to vector<8x1xf32>
    %58 = arith.addf %56, %57 : vector<8x1xf32>
    %cst_20 = arith.constant 0.000000e+00 : f32
    %59 = vector.broadcast %cst_20 : f32 to vector<8x1xf32>
    %60 = arith.maximumf %58, %59 : vector<8x1xf32>
    %c0_i32 = arith.constant 0 : i32
    %61 = arith.cmpi ne, %arg0, %c0_i32 : i32
    %62 = arith.extui %61 : i1 to i32
    %c0_i32_21 = arith.constant 0 : i32
    %63 = arith.cmpi ne, %62, %c0_i32_21 : i32
    scf.if %63 {
      %cst_24 = arith.constant 0.000000e+00 : f32
      %67 = vector.broadcast %cst_24 : f32 to vector<1x1xf32>
      %68 = vector.shape_cast %21 : vector<8x1xf32> to vector<1x8x1xf32>
      %cst_25 = arith.constant dense<0.000000e+00> : vector<1xf32>
      %69 = vector.multi_reduction <add>, %68, %cst_25 [1, 2] : vector<1x8x1xf32> to vector<1xf32>
      %70 = vector.shape_cast %69 : vector<1xf32> to vector<1x1x1xf32>
      %71 = vector.extract %70[0, 0, 0] : f32 from vector<1x1x1xf32>
      %72 = vector.broadcast %71 : f32 to vector<1x1xf32>
      %73 = arith.addf %67, %72 : vector<1x1xf32>
      %74 = vector.shape_cast %34 : vector<8x1xf32> to vector<1x8x1xf32>
      %cst_26 = arith.constant dense<0.000000e+00> : vector<1xf32>
      %75 = vector.multi_reduction <add>, %74, %cst_26 [1, 2] : vector<1x8x1xf32> to vector<1xf32>
      %76 = vector.shape_cast %75 : vector<1xf32> to vector<1x1x1xf32>
      %77 = vector.extract %76[0, 0, 0] : f32 from vector<1x1x1xf32>
      %78 = vector.broadcast %77 : f32 to vector<1x1xf32>
      %79 = arith.addf %73, %78 : vector<1x1xf32>
      %80 = vector.shape_cast %47 : vector<8x1xf32> to vector<1x8x1xf32>
      %cst_27 = arith.constant dense<0.000000e+00> : vector<1xf32>
      %81 = vector.multi_reduction <add>, %80, %cst_27 [1, 2] : vector<1x8x1xf32> to vector<1xf32>
      %82 = vector.shape_cast %81 : vector<1xf32> to vector<1x1x1xf32>
      %83 = vector.extract %82[0, 0, 0] : f32 from vector<1x1x1xf32>
      %84 = vector.broadcast %83 : f32 to vector<1x1xf32>
      %85 = arith.addf %79, %84 : vector<1x1xf32>
      %86 = vector.shape_cast %60 : vector<8x1xf32> to vector<1x8x1xf32>
      %cst_28 = arith.constant dense<0.000000e+00> : vector<1xf32>
      %87 = vector.multi_reduction <add>, %86, %cst_28 [1, 2] : vector<1x8x1xf32> to vector<1xf32>
      %88 = vector.shape_cast %87 : vector<1xf32> to vector<1x1x1xf32>
      %89 = vector.extract %88[0, 0, 0] : f32 from vector<1x1x1xf32>
      %90 = vector.broadcast %89 : f32 to vector<1x1xf32>
      %91 = arith.addf %85, %90 : vector<1x1xf32>
      %92 = vector.shape_cast %91 : vector<1x1xf32> to vector<1x1x1xf32>
      %c0_29 = arith.constant 0 : index
      %c0_30 = arith.constant 0 : index
      %c0_31 = arith.constant 0 : index
      %93 = vector.load %arg4[%c0_29, %c0_30, %c0_31] : memref<1x1x1xf32, #tpu.memory_space<vmem>>, vector<1x1x1xf32>
      tpu.vector_store %arg4[%c0_29, %c0_30, %c0_31], %92 {strides = array<i32>} : memref<1x1x1xf32, #tpu.memory_space<vmem>>, vector<1x1x1xf32>,
    } else {
    }
    %c0_i32_22 = arith.constant 0 : i32
    %64 = arith.cmpi eq, %arg0, %c0_i32_22 : i32
    %65 = arith.extui %64 : i1 to i32
    %c0_i32_23 = arith.constant 0 : i32
    %66 = arith.cmpi ne, %65, %c0_i32_23 : i32
    scf.if %66 {
      %cst_24 = arith.constant 0.000000e+00 : f32
      %67 = vector.broadcast %cst_24 : f32 to vector<1x1xf32>
      %c8_i32 = arith.constant 8 : i32
      %68 = arith.muli %arg0, %c8_i32 : i32
      %69 = tpu.iota {dimensions = array<i32: 0>} : vector<8x1xi32>
      %70 = vector.broadcast %68 : i32 to vector<8x1xi32>
      %71 = arith.addi %70, %69 : vector<8x1xi32>
      %c4_i32 = arith.constant 4 : i32
      %72 = vector.broadcast %c4_i32 : i32 to vector<8x1xi32>
      %73 = arith.muli %71, %72 : vector<8x1xi32>
      %c0_i32_25 = arith.constant 0 : i32
      %74 = vector.broadcast %c0_i32_25 : i32 to vector<8x1xi32>
      %75 = arith.addi %73, %74 : vector<8x1xi32>
      %c8_i32_26 = arith.constant 8 : i32
      %76 = vector.broadcast %c8_i32_26 : i32 to vector<8x1xi32>
      %77 = arith.cmpi slt, %75, %76 : vector<8x1xi32>
      %cst_27 = arith.constant 0.000000e+00 : f32
      %78 = vector.broadcast %cst_27 : f32 to vector<8x1xf32>
      %79 = arith.select %77, %21, %78 : vector<8x1xi1>, vector<8x1xf32>
      %80 = vector.shape_cast %79 : vector<8x1xf32> to vector<1x8x1xf32>
      %cst_28 = arith.constant dense<0.000000e+00> : vector<1xf32>
      %81 = vector.multi_reduction <add>, %80, %cst_28 [1, 2] : vector<1x8x1xf32> to vector<1xf32>
      %82 = vector.shape_cast %81 : vector<1xf32> to vector<1x1x1xf32>
      %83 = vector.extract %82[0, 0, 0] : f32 from vector<1x1x1xf32>
      %84 = vector.broadcast %83 : f32 to vector<1x1xf32>
      %85 = arith.addf %67, %84 : vector<1x1xf32>
      %c4_i32_29 = arith.constant 4 : i32
      %86 = vector.broadcast %c4_i32_29 : i32 to vector<8x1xi32>
      %87 = arith.muli %71, %86 : vector<8x1xi32>
      %c1_i32 = arith.constant 1 : i32
      %88 = vector.broadcast %c1_i32 : i32 to vector<8x1xi32>
      %89 = arith.addi %87, %88 : vector<8x1xi32>
      %c8_i32_30 = arith.constant 8 : i32
      %90 = vector.broadcast %c8_i32_30 : i32 to vector<8x1xi32>
      %91 = arith.cmpi slt, %89, %90 : vector<8x1xi32>
      %cst_31 = arith.constant 0.000000e+00 : f32
      %92 = vector.broadcast %cst_31 : f32 to vector<8x1xf32>
      %93 = arith.select %91, %34, %92 : vector<8x1xi1>, vector<8x1xf32>
      %94 = vector.shape_cast %93 : vector<8x1xf32> to vector<1x8x1xf32>
      %cst_32 = arith.constant dense<0.000000e+00> : vector<1xf32>
      %95 = vector.multi_reduction <add>, %94, %cst_32 [1, 2] : vector<1x8x1xf32> to vector<1xf32>
      %96 = vector.shape_cast %95 : vector<1xf32> to vector<1x1x1xf32>
      %97 = vector.extract %96[0, 0, 0] : f32 from vector<1x1x1xf32>
      %98 = vector.broadcast %97 : f32 to vector<1x1xf32>
      %99 = arith.addf %85, %98 : vector<1x1xf32>
      %c4_i32_33 = arith.constant 4 : i32
      %100 = vector.broadcast %c4_i32_33 : i32 to vector<8x1xi32>
      %101 = arith.muli %71, %100 : vector<8x1xi32>
      %c2_i32 = arith.constant 2 : i32
      %102 = vector.broadcast %c2_i32 : i32 to vector<8x1xi32>
      %103 = arith.addi %101, %102 : vector<8x1xi32>
      %c8_i32_34 = arith.constant 8 : i32
      %104 = vector.broadcast %c8_i32_34 : i32 to vector<8x1xi32>
      %105 = arith.cmpi slt, %103, %104 : vector<8x1xi32>
      %cst_35 = arith.constant 0.000000e+00 : f32
      %106 = vector.broadcast %cst_35 : f32 to vector<8x1xf32>
      %107 = arith.select %105, %47, %106 : vector<8x1xi1>, vector<8x1xf32>
      %108 = vector.shape_cast %107 : vector<8x1xf32> to vector<1x8x1xf32>
      %cst_36 = arith.constant dense<0.000000e+00> : vector<1xf32>
      %109 = vector.multi_reduction <add>, %108, %cst_36 [1, 2] : vector<1x8x1xf32> to vector<1xf32>
      %110 = vector.shape_cast %109 : vector<1xf32> to vector<1x1x1xf32>
      %111 = vector.extract %110[0, 0, 0] : f32 from vector<1x1x1xf32>
      %112 = vector.broadcast %111 : f32 to vector<1x1xf32>
      %113 = arith.addf %99, %112 : vector<1x1xf32>
      %c4_i32_37 = arith.constant 4 : i32
      %114 = vector.broadcast %c4_i32_37 : i32 to vector<8x1xi32>
      %115 = arith.muli %71, %114 : vector<8x1xi32>
      %c3_i32 = arith.constant 3 : i32
      %116 = vector.broadcast %c3_i32 : i32 to vector<8x1xi32>
      %117 = arith.addi %115, %116 : vector<8x1xi32>
      %c8_i32_38 = arith.constant 8 : i32
      %118 = vector.broadcast %c8_i32_38 : i32 to vector<8x1xi32>
      %119 = arith.cmpi slt, %117, %118 : vector<8x1xi32>
      %cst_39 = arith.constant 0.000000e+00 : f32
      %120 = vector.broadcast %cst_39 : f32 to vector<8x1xf32>
      %121 = arith.select %119, %60, %120 : vector<8x1xi1>, vector<8x1xf32>
      %122 = vector.shape_cast %121 : vector<8x1xf32> to vector<1x8x1xf32>
      %cst_40 = arith.constant dense<0.000000e+00> : vector<1xf32>
      %123 = vector.multi_reduction <add>, %122, %cst_40 [1, 2] : vector<1x8x1xf32> to vector<1xf32>
      %124 = vector.shape_cast %123 : vector<1xf32> to vector<1x1x1xf32>
      %125 = vector.extract %124[0, 0, 0] : f32 from vector<1x1x1xf32>
      %126 = vector.broadcast %125 : f32 to vector<1x1xf32>
      %127 = arith.addf %113, %126 : vector<1x1xf32>
      %128 = vector.shape_cast %127 : vector<1x1xf32> to vector<1x1x1xf32>
      %c0_41 = arith.constant 0 : index
      %c0_42 = arith.constant 0 : index
      %c0_43 = arith.constant 0 : index
      %129 = vector.load %arg4[%c0_41, %c0_42, %c0_43] : memref<1x1x1xf32, #tpu.memory_space<vmem>>, vector<1x1x1xf32>
      tpu.vector_store %arg4[%c0_41, %c0_42, %c0_43], %128 {strides = array<i32>} : memref<1x1x1xf32, #tpu.memory_space<vmem>>, vector<1x1x1xf32>,
    } else {
    }
    return
  }
  func.func @transform_0(%arg0: i32) -> (i32, i32) {
    %c0_i32 = arith.constant 0 : i32
    %c0_i32_0 = arith.constant 0 : i32
    return %arg0, %c0_i32 : i32, i32
  }
  func.func @transform_1(%arg0: i32) -> (i32, i32) {
    %c0_i32 = arith.constant 0 : i32
    %c0_i32_0 = arith.constant 0 : i32
    return %arg0, %c0_i32 : i32, i32
  }
  func.func @transform_2(%arg0: i32) -> (i32, i32) {
    %c0_i32 = arith.constant 0 : i32
    %c0_i32_0 = arith.constant 0 : i32
    return %arg0, %c0_i32 : i32, i32
  }
  func.func @transform_3(%arg0: i32) -> (i32, i32, i32) {
    %c0_i32 = arith.constant 0 : i32
    %c0_i32_0 = arith.constant 0 : i32
    %c0_i32_1 = arith.constant 0 : i32
    return %arg0, %c0_i32, %c0_i32_0 : i32, i32, i32
  }
}

</mosaic_0001>

<bundles_post_ra>
// kernel: tpu_custom_call.1
= control target key start
LH: loop header
LB: loop body
LE: loop exit
PB: predicated region body
PF: predicated region fallthrough
CT: control target
= control target key end

     0   :  { %8 = vsyncpa [#allocation3], 0  ;;  %s439_s0 = inlined_call_operand.hbm [shape: f32[2,128], index: 0, kind: input, shape index: {}]   ;;  %s440_s1 = inlined_call_operand.vmem [shape: f32[2,128], index: 1, kind: input, shape index: {}]   ;;  %s441_s2 = inlined_call_operand.vmem [shape: f32[2,128], index: 2, kind: input, shape index: {}]   ;;  %s442_s3 = inlined_call_operand.hbm [shape: f32[1,1,1], index: 3, kind: output, shape index: {}]  }
   0x1   :  { %9 = vsyncpa [#allocation4], 0 }
   0x2   :  { %14 = vsyncadd [#allocation3], 96  ;;  %s370_s12 = smov [#allocation2]   ;;  %s322_s16 = scalar_lea.hbm %s439_s0, 32 }
   0x3   :  { %s15_s13 = sshll.u32 %s370_s12, 4  ;;  %p323_p0 = scmp.ne.s32.totalorder %s439_s0, %s322_s16  ;;  %s16_s13 = int_to_ptr.vmem [resolvable:$true] %s15_s13 }
   0x4   :  { %p326_p1 = scmp.lt.u32.totalorder %s322_s16, %s439_s0 }
   0x6   :  { %p328_p2 = pnand %p326_p1, %p323_p0 }
   0x8   :  { %331 = shalt.err (!%p328_p2)
}
   0x9   :  { %s332_s21 = scalar_lea.vmem %s16_s13, 32  ;;  %s336_s22 = scalar_lea.vmem %s16_s13, 128 }
   0xa   :  { %p333_p3 = scmp.ne.s32.totalorder %s16_s13, %s332_s21  ;;  %p337_p4 = scmp.lt.s32.totalorder %s16_s13, %s16_s13 }
   0xb   :  { %p338_p5 = scmp.lt.s32.totalorder %s336_s22, %s332_s21 }
   0xd   :  { %p339_p6 = por %p338_p5, %p337_p4 }
   0xf   :  { %p340_p7 = pnand %p339_p6, %p333_p3 }
  0x11   :  { %343 = shalt.err (!%p340_p7)
}
  0x12   :  { %s371_s23 = smov 32   ;;  %s372_s24 = smov 2  }
  0x13   :  { %21 = dma.hbm_to_vmem [thread:$0]  %s439_s0, 32, %s16_s13, [#allocation3], %s371_s23, %s371_s23, %s372_s24  }
  0x14   :  { %366 = dma.done.wait [#allocation3], 128  }
  0x15   :  { %367 = vsyncadd [#allocation3], 4294967168  ;;  %v29_v0 = vld [vmem:[#allocation2] sm:$0xff]  ;;  %s373_s4 = smov 64   ;;  %s374_s5 = smov 96   ;;  %vm37_vm0 = vcmask 261120   ;;  %v210_v26 = vlaneseq }
  0x16   :  { %v30_v1 = vld [vmem:[%s440_s1] sm:$0xff]  ;;  %v32_v3 = vadd.f32 1e-06, %v29_v0  ;;  %vm217_vm6 = vcmask 7168   ;;  %s375_s6 = smov [#allocation5]  }
  0x17   :  { %v31_v2 = vld [vmem:[%s441_s2] sm:$0xff]  ;;  %v211_v31 = vshrl.u32 %v210_v26, 7  ;;  %s283_s7 = sshll.u32 %s375_s6, 4  ;;  %s284_s7 = int_to_ptr.vmem [resolvable:$true] %s283_s7 }
  0x18   :  { %v33_v4 = vsub.f32 %v32_v3, %v30_v1  ;;  %v34_v5 = vsub.f32 %v32_v3, %v31_v2  ;;  %s344_s9 = scalar_lea.vmem %s284_s7, 16  ;;  %s348_s10 = scalar_lea.vmem %s284_s7, 32 }
  0x19   :  { %v214_v36 = vmul.u32 4, %v211_v31  ;;  %p345_p8 = scmp.ne.s32.totalorder %s284_s7, %s344_s9  ;;  %p349_p9 = scmp.lt.s32.totalorder %s284_s7, %s284_s7 }
  0x1a   :  { %v35_v6 = vmul.f32 %v33_v4, %v33_v4  ;;  %v36_v7 = vmul.f32 %v34_v5, %v34_v5  ;;  %p350_p10 = scmp.lt.s32.totalorder %s348_s10, %s344_s9 }
  0x1b   :  { %vm215_vm5 = vcmp.lt.s32.totalorder %v214_v36, 8  ;;  %v230_v55 = vadd.s32 1, %v214_v36  ;;  %v245_v4 = vadd.s32 2, %v214_v36  ;;  %v260_v5 = vadd.s32 3, %v214_v36 }
  0x1c   :  { %92 = vrot.lane.b32.xlu1 %v35_v6, %s373_s4  ;;  %62 = vrot.lane.b32.xlu0 %v35_v6, %s374_s5  ;;  %v38_v8 = vsel %vm37_vm0, %v35_v6, 0.0  ;;  %v48_v9 = vsel %vm37_vm0, %v36_v7, 0.0  ;;  %p351_p11 = por %p350_p10, %p349_p9 }
  0x1d   :  { %vm231_vm12 = vcmp.lt.s32.totalorder %v230_v55, 8 }
  0x1e   :  { %p352_p12 = pnand %p351_p11, %p345_p8 }
  0x20   :  { %76 = vrot.lane.b32.xlu0 %v36_v7, %s374_s5  ;;  %105 = vrot.lane.b32.xlu1 %v36_v7, %s373_s4 }
  0x24   :  { %121 = vrot.lane.b32.xlu0 %v35_v6, %s371_s23  ;;  %134 = vrot.lane.b32.xlu1 %v36_v7, %s371_s23 }
  0x43   :  { %39 = vadd.xlane.f32.xlu0 %v38_v8 }
  0x48   :  { %49 = vadd.xlane.f32.xlu1 %v48_v9 }
  0x8e   :  { %v93_v10 = vpop.permute.xlu1 %92  ;;  %v63_v11 = vpop.permute.xlu0 %62 }
  0x8f   :  { %v95_v12 = vsel %vm37_vm0, %v93_v10, 0.0  ;;  %v65_v13 = vsel %vm37_vm0, %v63_v11, 0.0 }
  0x90   :  { %96 = vadd.xlane.f32.xlu1 %v95_v12  ;;  %66 = vadd.xlane.f32.xlu0 %v65_v13 }
  0x92   :  { %v77_v14 = vpop.permute.xlu0 %76  ;;  %v106_v15 = vpop.permute.xlu1 %105 }
  0x93   :  { %v79_v16 = vsel %vm37_vm0, %v77_v14, 0.0  ;;  %v108_v17 = vsel %vm37_vm0, %v106_v15, 0.0 }
  0x94   :  { %80 = vadd.xlane.f32.xlu0 %v79_v16 }
  0x96   :  { %v122_v18 = vpop.permute.xlu0 %121  ;;  %v135_v19 = vpop.permute.xlu1 %134 }
  0x97   :  { %v124_v20 = vsel %vm37_vm0, %v122_v18, 0.0  ;;  %v137_v21 = vsel %vm37_vm0, %v135_v19, 0.0 }
  0x98   :  { %125 = vadd.xlane.f32.xlu1 %v124_v20  ;;  %109 = vadd.xlane.f32.xlu0 %v108_v17 }
  0x9c   :  { %138 = vadd.xlane.f32.xlu0 %v137_v21 }
  0xd0   :  { %v40_v22 = vpop.xlane.xlu0 %39 }
  0xd1   :  { %306 = vrsqrt.f32 %v40_v22  ;;  %vm43_vm1 = vcmp.eq.f32.partialorder %v40_v22, inf  ;;  %v46_v27 = vand.u32 2147483648, %v40_v22  ;;  %vm45_vm2 = vcmp.eq.f32.partialorder %v40_v22, 0.0 }
  0xd5   :  { %v50_v23 = vpop.xlane.xlu1 %49 }
  0xd6   :  { %308 = vrsqrt.f32 %v50_v23  ;;  %vm53_vm3 = vcmp.eq.f32.partialorder %v50_v23, inf  ;;  %v56_v30 = vand.u32 2147483648, %v50_v23  ;;  %vm55_vm4 = vcmp.eq.f32.partialorder %v50_v23, 0.0 }
  0xdb   :  { %v307_v24 = vpop.eup %306 }
  0xdc   :  { %v42_v25 = vmul.f32 %v307_v24, %v40_v22 }
  0xde   :  { %v44_v28 = vsel %vm43_vm1, %v40_v22, %v42_v25 }
  0xdf   :  { %v47_v33 = vsel %vm45_vm2, %v46_v27, %v44_v28 }
  0xe0   :  { %v309_v29 = vpop.eup %308 }
  0xe1   :  { %v52_v32 = vmul.f32 %v309_v29, %v50_v23 }
  0xe3   :  { %v54_v34 = vsel %vm53_vm3, %v50_v23, %v52_v32 }
  0xe4   :  { %v57_v35 = vsel %vm55_vm4, %v56_v30, %v54_v34  ;;  %vm246_vm4 = vcmp.lt.s32.totalorder %v245_v4, 8 }
  0xe5   :  { %v58_v37 = vsub.f32 %v47_v33, %v57_v35 }
  0xe7   :  { %v59_v38 = vadd.f32 1.0, %v58_v37 }
  0xe9   :  { %v60_v39 = vmax.f32 %v59_v38, 0.0 }
  0xeb   :  { %v216_v40 = vsel %vm215_vm5, %v60_v39, 0.0  ;;  %vm261_vm5 = vcmp.lt.s32.totalorder %v260_v5, 8 }
  0xec   :  { %v218_v41 = vsel %vm217_vm6, %v216_v40, 0.0 }
  0xed   :  { %219 = vadd.xlane.f32.xlu1 %v218_v41 }
 0x11d   :  { %v97_v42 = vpop.xlane.xlu1 %96  ;;  %v67_v43 = vpop.xlane.xlu0 %66 }
 0x11e   :  { %310 = vrsqrt.f32 %v67_v43  ;;  %vm70_vm7 = vcmp.eq.f32.partialorder %v67_v43, inf  ;;  %v73_v56 = vand.u32 2147483648, %v67_v43  ;;  %vm72_vm9 = vcmp.eq.f32.partialorder %v67_v43, 0.0 }
 0x11f   :  { %312 = vrsqrt.f32 %v97_v42  ;;  %vm100_vm11 = vcmp.eq.f32.partialorder %v97_v42, inf  ;;  %v103_v3 = vand.u32 2147483648, %v97_v42  ;;  %vm102_vm13 = vcmp.eq.f32.partialorder %v97_v42, 0.0 }
 0x121   :  { %v81_v44 = vpop.xlane.xlu0 %80 }
 0x122   :  { %314 = vrsqrt.f32 %v81_v44  ;;  %vm84_vm8 = vcmp.eq.f32.partialorder %v81_v44, inf  ;;  %v87_v57 = vand.u32 2147483648, %v81_v44  ;;  %vm86_vm10 = vcmp.eq.f32.partialorder %v81_v44, 0.0 }
 0x125   :  { %v126_v45 = vpop.xlane.xlu1 %125  ;;  %v110_v46 = vpop.xlane.xlu0 %109 }
 0x126   :  { %316 = vrsqrt.f32 %v126_v45  ;;  %vm113_vm14 = vcmp.eq.f32.partialorder %v110_v46, inf  ;;  %v116_v7 = vand.u32 2147483648, %v110_v46  ;;  %vm115_vm15 = vcmp.eq.f32.partialorder %v110_v46, 0.0 }
 0x127   :  { %318 = vrsqrt.f32 %v110_v46  ;;  %vm129_vm0 = vcmp.eq.f32.partialorder %v126_v45, inf  ;;  %v132_v16 = vand.u32 2147483648, %v126_v45  ;;  %vm131_vm2 = vcmp.eq.f32.partialorder %v126_v45, 0.0 }
 0x128   :  { %v311_v47 = vpop.eup %310 }
 0x129   :  { %v139_v48 = vpop.xlane.xlu0 %138  ;;  %v313_v49 = vpop.eup %312  ;;  %v69_v50 = vmul.f32 %v311_v47, %v67_v43 }
 0x12a   :  { %320 = vrsqrt.f32 %v139_v48  ;;  %v99_v52 = vmul.f32 %v313_v49, %v97_v42  ;;  %vm142_vm1 = vcmp.eq.f32.partialorder %v139_v48, inf  ;;  %v145_v17 = vand.u32 2147483648, %v139_v48 }
 0x12b   :  { %v71_v54 = vsel %vm70_vm7, %v67_v43, %v69_v50  ;;  %vm144_vm3 = vcmp.eq.f32.partialorder %v139_v48, 0.0 }
 0x12c   :  { %v315_v51 = vpop.eup %314  ;;  %v74_v60 = vsel %vm72_vm9, %v73_v56, %v71_v54  ;;  %v101_v1 = vsel %vm100_vm11, %v97_v42, %v99_v52 }
 0x12d   :  { %v83_v53 = vmul.f32 %v315_v51, %v81_v44  ;;  %v104_v9 = vsel %vm102_vm13, %v103_v3, %v101_v1 }
 0x12f   :  { %v85_v58 = vsel %vm84_vm8, %v81_v44, %v83_v53 }
 0x130   :  { %v317_v59 = vpop.eup %316  ;;  %v88_v61 = vsel %vm86_vm10, %v87_v57, %v85_v58 }
 0x131   :  { %v319_v62 = vpop.eup %318  ;;  %v128_v63 = vmul.f32 %v317_v59, %v126_v45  ;;  %v89_v0 = vsub.f32 %v74_v60, %v88_v61 }
 0x132   :  { %v112_v2 = vmul.f32 %v319_v62, %v110_v46 }
 0x133   :  { %v90_v6 = vadd.f32 1.0, %v89_v0  ;;  %v130_v14 = vsel %vm129_vm0, %v126_v45, %v128_v63 }
 0x134   :  { %v321_v8 = vpop.eup %320  ;;  %v114_v10 = vsel %vm113_vm14, %v110_v46, %v112_v2  ;;  %v133_v22 = vsel %vm131_vm2, %v132_v16, %v130_v14 }
 0x135   :  { %v141_v11 = vmul.f32 %v321_v8, %v139_v48  ;;  %v91_v12 = vmax.f32 %v90_v6, 0.0  ;;  %v117_v13 = vsel %vm115_vm15, %v116_v7, %v114_v10 }
 0x136   :  { %v118_v15 = vsub.f32 %v104_v9, %v117_v13 }
 0x137   :  { %v232_v18 = vsel %vm231_vm12, %v91_v12, 0.0  ;;  %v143_v19 = vsel %vm142_vm1, %v139_v48, %v141_v11 }
 0x138   :  { %v233_v20 = vsel %vm217_vm6, %v232_v18, 0.0  ;;  %v119_v21 = vadd.f32 1.0, %v118_v15  ;;  %v146_v23 = vsel %vm144_vm3, %v145_v17, %v143_v19 }
 0x139   :  { %234 = vadd.xlane.f32.xlu0 %v233_v20  ;;  %v147_v24 = vsub.f32 %v133_v22, %v146_v23 }
 0x13a   :  { %v120_v25 = vmax.f32 %v119_v21, 0.0 }
 0x13b   :  { %v148_v26 = vadd.f32 1.0, %v147_v24 }
 0x13c   :  { %v247_v27 = vsel %vm246_vm4, %v120_v25, 0.0 }
 0x13d   :  { %v248_v28 = vsel %vm217_vm6, %v247_v27, 0.0  ;;  %v149_v29 = vmax.f32 %v148_v26, 0.0 }
 0x13e   :  { %249 = vadd.xlane.f32.xlu1 %v248_v28 }
 0x13f   :  { %v262_v30 = vsel %vm261_vm5, %v149_v29, 0.0 }
 0x140   :  { %v263_v31 = vsel %vm217_vm6, %v262_v30, 0.0  ;;  %vm275_vm6 = vcmask 0  }
 0x141   :  { %264 = vadd.xlane.f32.xlu0 %v263_v31 }
 0x17a   :  { %v220_v32 = vpop.xlane.xlu1 %219 }
 0x17b   :  { %v221_v33 = vrot.slane %v220_v32, 4 }
 0x17d   :  { %v222_v34 = vadd.f32 %v221_v33, %v220_v32 }
 0x17f   :  { %v223_v35 = vrot.slane %v222_v34, 2 }
 0x181   :  { %v224_v36 = vadd.f32 %v223_v35, %v222_v34 }
 0x183   :  { %v225_v37 = vrot.slane %v224_v36, 1 }
 0x185   :  { %v226_v38 = vadd.f32 %v225_v37, %v224_v36 }
 0x187   :  { %292 = vpush %v226_v38 }
 0x1b8   :  { %s293_s0 = spop %292 }
 0x1b9   :  { %v228_v61 = vstv %s293_s0 }
 0x1c6   :  { %v235_v39 = vpop.xlane.xlu0 %234 }
 0x1c7   :  { %v236_v40 = vrot.slane %v235_v39, 4 }
 0x1c9   :  { %v237_v41 = vadd.f32 %v236_v40, %v235_v39 }
 0x1cb   :  { %v238_v42 = vrot.slane %v237_v41, 2  ;;  %v250_v43 = vpop.xlane.xlu1 %249 }
 0x1cc   :  { %v251_v44 = vrot.slane %v250_v43, 4 }
 0x1cd   :  { %v239_v45 = vadd.f32 %v238_v42, %v237_v41 }
 0x1ce   :  { %v252_v46 = vadd.f32 %v251_v44, %v250_v43  ;;  %v265_v47 = vpop.xlane.xlu0 %264 }
 0x1cf   :  { %v266_v48 = vrot.slane %v265_v47, 4  ;;  %v240_v49 = vrot.slane %v239_v45, 1 }
 0x1d0   :  { %v253_v50 = vrot.slane %v252_v46, 2 }
 0x1d1   :  { %v267_v51 = vadd.f32 %v266_v48, %v265_v47  ;;  %v241_v52 = vadd.f32 %v240_v49, %v239_v45 }
 0x1d2   :  { %v254_v53 = vadd.f32 %v253_v50, %v252_v46 }
 0x1d3   :  { %v268_v54 = vrot.slane %v267_v51, 2  ;;  %294 = vpush %v241_v52 }
 0x1d4   :  { %v255_v55 = vrot.slane %v254_v53, 1 }
 0x1d5   :  { %v269_v56 = vadd.f32 %v268_v54, %v267_v51 }
 0x1d6   :  { %v256_v57 = vadd.f32 %v255_v55, %v254_v53 }
 0x1d7   :  { %v270_v58 = vrot.slane %v269_v56, 1 }
 0x1d8   :  { %296 = vpush %v256_v57 }
 0x1d9   :  { %v271_v59 = vadd.f32 %v270_v58, %v269_v56 }
 0x1db   :  { %298 = vpush %v271_v59 }
 0x204   :  { %s295_s1 = spop %294 }
 0x205   :  { %v243_v60 = vstv %s295_s1 }
 0x206   :  { %v244_v62 = vadd.f32 %v243_v60, %v228_v61 }
 0x209   :  { %s297_s2 = spop %296 }
 0x20a   :  { %v258_v63 = vstv %s297_s2 }
 0x20b   :  { %v259_v0 = vadd.f32 %v258_v63, %v244_v62 }
 0x20c   :  { %s299_s8 = spop %298 }
 0x20d   :  { %v273_v1 = vstv %s299_s8 }
 0x20e   :  { %v274_v2 = vadd.f32 %v273_v1, %v259_v0 }
 0x210   :  { %276 = vst.msk [vmem:[#allocation5] sm:$0x1] %vm275_vm6, %v274_v2 }
 0x211   :  { %355 = shalt.err (!%p352_p12)
}
 0x212   :  { %s356_s13 = scalar_lea.hbm %s442_s3, 16 }
 0x213   :  { %p357_p13 = scmp.ne.s32.totalorder %s442_s3, %s356_s13  ;;  %p360_p0 = scmp.lt.u32.totalorder %s356_s13, %s442_s3 }
 0x215   :  { %p362_p1 = pnand %p360_p0, %p357_p13 }
 0x217   :  { %365 = shalt.err (!%p362_p1)
}
 0x218   :  { %286 = dma.vmem_to_hbm [thread:$0]  %s284_s7, 16, %s442_s3, [#allocation4]  }
 0x219   :  { %368 = dma.done.wait [#allocation4], 16  }
 0x21a   :  { %369 = vsyncadd [#allocation4], 4294967280 }
 0x21b   :  { %290 = vsyncpa [#allocation3], 1 }
 0x21c   :  { %291 = vsyncpa [#allocation4], 1 }

</bundles_post_ra>
